<compile_context>
chip_gen: v7x
topology: tpu7x:2x2x1
jax: 0.10.0
libtpu: 0.0.40
codegen_flags: <defaults>
</compile_context>

<pallas_src>
import functools

import numpy as np
import jax
import jax.numpy as jnp
from jax import lax
from jax.experimental import pallas as pl
from jax.experimental.pallas import tpu as pltpu


def _round_up(x, m):
    return (x + m - 1) // m * m


def _feature_tokenizer_kernel(cont_ref, idx_ref, wc_ref, wcat_ref, o_ref, *,
                              cat_nums, precision):
    bt = cont_ref.shape[0]
    kcat = wcat_ref.shape[0]

    # Continuous / CLS tokens (bias folded into wc row 0; CLS lane is exactly 1.0).
    acc = jnp.dot(cont_ref[...], wc_ref[...],
                  preferred_element_type=jnp.float32, precision=precision)

    # Categorical tokens: one-hot over the padded vocabulary, gathered with one MXU dot.
    # Per-feature compare masks are disjoint (indices arrive pre-offset per feature), so
    # OR-accumulate the booleans and cast once at the end.
    idx = idx_ref[...]                                          # [BT, cat_nums] int32
    iota = lax.broadcasted_iota(jnp.int32, (bt, kcat), 1)       # hoisted, shared by all features
    hit = iota == idx[:, 0:1]
    for j in range(1, cat_nums):
        # TODO(synk): for cat_nums in the tens, switch to lax.fori_loop(..., unroll=k)
        # to cap code size / vreg pressure.
        hit = jnp.logical_or(hit, iota == idx[:, j:j + 1])
    onehot = hit.astype(wcat_ref.dtype)
    acc = acc + jnp.dot(onehot, wcat_ref[...],
                        preferred_element_type=jnp.float32, precision=precision)

    # Single lane-dense slab store (td_pad is a multiple of 128 -> unmasked vst).
    o_ref[...] = acc.astype(o_ref.dtype)


def feature_tokenizer(x, weight, cat_weights, bias, *, cat_dims, cont_nums, emb_dim,
                      block_b=None, dot_dtype=jnp.bfloat16, out_dtype=jnp.float32):
    B, F = x.shape
    cat_nums = len(cat_dims)
    total_cat = int(sum(cat_dims))
    assert cat_nums >= 1, "kernel assumes at least one categorical feature"
    assert F == cat_nums + cont_nums
    D = emb_dim
    kc = 1 + cont_nums                 # CLS + continuous selector lanes (dense, no padding)
    T = kc + cat_nums                  # output tokens
    td = T * D
    td_pad = _round_up(td, 128)        # lane-dense output slab width
    kcat_pad = _round_up(total_cat, 128)

    # Batch tile: >=2 grid steps when possible so the "parallel" axis shards across both
    # TensorCores on v7x, while keeping tiles large to amortize per-step overhead.
    if block_b is None:
        block_b = B
        for cand in (1024, 512, 256, 128, 64, 32, 16, 8):
            if B % cand == 0 and B // cand >= 2:
                block_b = cand
                break
    # TODO(synk): pad ragged batches wrapper-side instead of asserting divisibility.
    assert B % block_b == 0
    assert block_b == B or block_b % 8 == 0

    precision = lax.Precision.HIGHEST if jnp.dtype(dot_dtype) == jnp.float32 else None

    # ---- input plumbing (cheap XLA ops) ----
    offsets = np.cumsum([0] + list(cat_dims[:-1])).astype(np.int32)
    # Categorical indices with vocab offsets applied; out-of-range/negative indices yield a
    # zero embedding (PyTorch nn.Embedding would error) -- caller must pass valid indices.
    x_idx = x[:, :cat_nums].astype(jnp.int32) + jnp.asarray(offsets)[None, :]
    # Dense continuous lanes: [1 (CLS), x_cont...]; no dead zero lanes are DMA'd.
    x_cont = jnp.concatenate(
        [jnp.ones((B, 1), jnp.float32), x[:, cat_nums:].astype(jnp.float32)],
        axis=1).astype(dot_dtype)                                   # [B, kc]

    # ---- one-time parameter rearrangement (hoist out of the step path in training) ----
    weight_f = weight.astype(jnp.float32)
    bias_f = bias.astype(jnp.float32)
    cat_w_f = cat_weights.astype(jnp.float32)

    # W_cont: row c carries weight[c] in token c's D-wide column range (block diagonal),
    # bias (zero CLS row prepended) folded into row 0.
    w_cont = (jnp.eye(kc, dtype=jnp.float32)[:, :, None]
              * weight_f[:, None, :]).reshape(kc, kc * D)
    w_cont = jnp.pad(w_cont, ((0, 0), (0, td_pad - kc * D)))
    bias_flat = jnp.concatenate([jnp.zeros((1, D), jnp.float32), bias_f],
                                axis=0).reshape(1, td)
    bias_flat = jnp.pad(bias_flat, ((0, 0), (0, td_pad - td)))
    w_cont = w_cont.at[0:1, :].add(bias_flat)

    # W_cat: vocab row r of feature j carries cat_weights[r] in token (kc+j)'s column range.
    # Assembled from per-feature padded blocks + one concatenate (no per-row scatters).
    blocks = []
    start = 0
    for j, d in enumerate(cat_dims):
        tok = kc + j
        blocks.append(jnp.pad(cat_w_f[start:start + d],
                              ((0, 0), (tok * D, td_pad - tok * D - D))))
        start += d
    w_cat = jnp.concatenate(blocks, axis=0)
    w_cat = jnp.pad(w_cat, ((0, kcat_pad - total_cat), (0, 0)))

    w_cont = w_cont.astype(dot_dtype)
    w_cat = w_cat.astype(dot_dtype)

    # ---- VMEM budget (inputs double-buffered, weights single-buffered, output x2) ----
    itemsize = jnp.dtype(dot_dtype).itemsize
    out_itemsize = jnp.dtype(out_dtype).itemsize
    vmem_need = (2 * block_b * (kc * itemsize + cat_nums * 4)
                 + (kc + kcat_pad) * td_pad * itemsize
                 + 2 * block_b * td_pad * out_itemsize)
    vmem_limit = int(min(max(32 << 20, 2 * vmem_need + (8 << 20)), 64 << 20))

    kernel = functools.partial(_feature_tokenizer_kernel,
                               cat_nums=cat_nums, precision=precision)

    out_flat = pl.pallas_call(
        kernel,
        out_shape=jax.ShapeDtypeStruct((B, td_pad), out_dtype),
        grid_spec=pltpu.PrefetchScalarGridSpec(
            num_scalar_prefetch=0,
            grid=(B // block_b,),
            in_specs=[
                pl.BlockSpec((block_b, kc), lambda i: (i, 0)),        # CLS + continuous lanes
                pl.BlockSpec((block_b, cat_nums), lambda i: (i, 0)),  # offset cat indices
                pl.BlockSpec((kc, td_pad), lambda i: (0, 0),
                             pipeline_mode=pl.Buffered(1)),           # resident weights
                pl.BlockSpec((kcat_pad, td_pad), lambda i: (0, 0),
                             pipeline_mode=pl.Buffered(1)),           # resident embeddings
            ],
            out_specs=pl.BlockSpec((block_b, td_pad), lambda i: (i, 0)),
        ),
        compiler_params=pltpu.CompilerParams(
            dimension_semantics=("parallel",),
            vmem_limit_bytes=vmem_limit,
        ),
    )(x_cont, x_idx, w_cont, w_cat)

    return out_flat[:, :td].reshape(B, T, D)


def feature_tokenizer_ref(x, weight, cat_weights, bias, *, cat_dims, cont_nums, emb_dim):
    """Pure-JAX reference mirroring the PyTorch forward."""
    cat_nums = len(cat_dims)
    offsets = jnp.cumsum(jnp.array([0] + list(cat_dims[:-1]), jnp.int32))
    x_cats = x[:, :cat_nums].astype(jnp.int32)
    x_conts = x[:, cat_nums:]
    x_conts = jnp.concatenate([jnp.ones((x.shape[0], 1), x.dtype), x_conts], axis=1)
    out = weight[None] * x_conts[:, :, None]
    cat_tok = cat_weights[x_cats + offsets[None]]
    out = jnp.concatenate([out, cat_tok], axis=1)
    bias_full = jnp.concatenate([jnp.zeros((1, emb_dim), bias.dtype), bias], axis=0)
    return out + bias_full[None]


if __name__ == "__main__":
    emb_dim = 32
    cont_nums = 3
    cat_dims = [3, 5, 4]
    cat_nums = len(cat_dims)
    total_cat = sum(cat_dims)
    B = 16

    key = jax.random.PRNGKey(0)
    k_w, k_b, k_e, k_cat, k_cont = jax.random.split(key, 5)

    weight = jax.random.normal(k_w, (cont_nums + 1, emb_dim), jnp.float32) * 0.1
    bias = jax.random.normal(k_b, (cont_nums + cat_nums, emb_dim), jnp.float32) * 0.1
    cat_weights = jax.random.normal(k_e, (total_cat, emb_dim), jnp.float32) * 0.1

    # Input: categorical index columns (as floats) then continuous columns.
    cat_cols = []
    for j, d in enumerate(cat_dims):
        kj = jax.random.fold_in(k_cat, j)
        cat_cols.append(jax.random.randint(kj, (B, 1), 0, d).astype(jnp.float32))
    conts = jax.random.normal(k_cont, (B, cont_nums), jnp.float32)
    x = jnp.concatenate(cat_cols + [conts], axis=1)          # [B, cat_nums + cont_nums]

    ref = feature_tokenizer_ref(x, weight, cat_weights, bias,
                                cat_dims=cat_dims, cont_nums=cont_nums, emb_dim=emb_dim)

    # f32 / HIGHEST-precision path: bit-near parity with the PyTorch forward.
    # (default block_b gives a 2-step "parallel" grid here.)
    out_f32 = feature_tokenizer(x, weight, cat_weights, bias,
                                cat_dims=cat_dims, cont_nums=cont_nums, emb_dim=emb_dim,
                                dot_dtype=jnp.float32)
    out_f32 = jax.block_until_ready(out_f32)
    assert out_f32.shape == (B, 1 + cont_nums + cat_nums, emb_dim)
    assert jnp.allclose(out_f32, ref, atol=1e-5, rtol=1e-5)

    # bf16 MXU path (default): one-hot lanes exact, continuous values / embedding values
    # rounded to bf16 -> looser tolerance.
    out_bf16 = feature_tokenizer(x, weight, cat_weights, bias,
                                 cat_dims=cat_dims, cont_nums=cont_nums, emb_dim=emb_dim)
    out_bf16 = jax.block_until_ready(out_bf16)
    assert jnp.allclose(out_bf16, ref, atol=2e-2, rtol=2e-2)

    # Single-step grid (whole batch in one tile) also exercised.
    out_one = feature_tokenizer(x, weight, cat_weights, bias,
                                cat_dims=cat_dims, cont_nums=cont_nums, emb_dim=emb_dim,
                                block_b=B, dot_dtype=jnp.float32)
    out_one = jax.block_until_ready(out_one)
    assert jnp.allclose(out_one, ref, atol=1e-5, rtol=1e-5)

    print("KERNEL_OK")
</pallas_src>

<mosaic_0001>
module attributes {stable_mosaic.version = 11 : i64} {
  func.func @_feature_tokenizer_kernel(%arg0: i32, %arg1: memref<8x4xf32, #tpu.memory_space<vmem>>, %arg2: memref<8x3xi32, #tpu.memory_space<vmem>>, %arg3: memref<4x256xf32, #tpu.memory_space<vmem>>, %arg4: memref<128x256xf32, #tpu.memory_space<vmem>>, %arg5: memref<8x256xf32, #tpu.memory_space<vmem>>) attributes {dimension_semantics = [#tpu.dimension_semantics<parallel>], iteration_bounds = array<i64: 2>, scalar_prefetch = 0 : i64, scratch_operands = 0 : i64, tpu.core_type = #tpu.core_type<tc>, window_params = [{transform_indices = @transform_0, window_bounds = array<i64: 8, 4>}, {transform_indices = @transform_1, window_bounds = array<i64: 8, 3>}, {pipeline_mode = #tpu.pipeline_mode<synchronous>, transform_indices = @transform_2, window_bounds = array<i64: 4, 256>}, {pipeline_mode = #tpu.pipeline_mode<synchronous>, transform_indices = @transform_3, window_bounds = array<i64: 128, 256>}, {transform_indices = @transform_4, window_bounds = array<i64: 8, 256>}]} {
    %c0 = arith.constant 0 : index
    %c0_0 = arith.constant 0 : index
    %0 = vector.load %arg1[%c0, %c0_0] : memref<8x4xf32, #tpu.memory_space<vmem>>, vector<8x4xf32>
    %c0_1 = arith.constant 0 : index
    %c0_2 = arith.constant 0 : index
    %1 = vector.load %arg3[%c0_1, %c0_2] : memref<4x256xf32, #tpu.memory_space<vmem>>, vector<4x256xf32>
    %cst = arith.constant dense<0.000000e+00> : vector<8x256xf32>
    %2 = tpu.matmul %0, %1, %cst {dimension_numbers = #tpu.dot_dimension_numbers<[1], [0], [0], [1], [0, 0, 1, 1], [], []>, precision = #tpu.contract_precision<fp32>} : vector<8x4xf32>, vector<4x256xf32>, vector<8x256xf32> -> vector<8x256xf32>
    %c0_3 = arith.constant 0 : index
    %c0_4 = arith.constant 0 : index
    %3 = vector.load %arg2[%c0_3, %c0_4] : memref<8x3xi32, #tpu.memory_space<vmem>>, vector<8x3xi32>
    %4 = tpu.iota {dimensions = array<i32: 1>} : vector<8x128xi32>
    %5 = vector.extract_strided_slice %3 {offsets = [0, 0], sizes = [8, 1], strides = [1, 1]} : vector<8x3xi32> to vector<8x1xi32>
    %6 = vector.broadcast %5 : vector<8x1xi32> to vector<8x128xi32>
    %7 = arith.cmpi eq, %4, %6 : vector<8x128xi32>
    %8 = vector.extract_strided_slice %3 {offsets = [0, 1], sizes = [8, 1], strides = [1, 1]} : vector<8x3xi32> to vector<8x1xi32>
    %9 = vector.broadcast %8 : vector<8x1xi32> to vector<8x128xi32>
    %10 = arith.cmpi eq, %4, %9 : vector<8x128xi32>
    %11 = arith.ori %7, %10 : vector<8x128xi1>
    %12 = vector.extract_strided_slice %3 {offsets = [0, 2], sizes = [8, 1], strides = [1, 1]} : vector<8x3xi32> to vector<8x1xi32>
    %13 = vector.broadcast %12 : vector<8x1xi32> to vector<8x128xi32>
    %14 = arith.cmpi eq, %4, %13 : vector<8x128xi32>
    %15 = arith.ori %11, %14 : vector<8x128xi1>
    %16 = arith.extui %15 : vector<8x128xi1> to vector<8x128xi32>
    %17 = arith.sitofp %16 : vector<8x128xi32> to vector<8x128xf32>
    %c0_5 = arith.constant 0 : index
    %c0_6 = arith.constant 0 : index
    %18 = vector.load %arg4[%c0_5, %c0_6] : memref<128x256xf32, #tpu.memory_space<vmem>>, vector<128x256xf32>
    %cst_7 = arith.constant dense<0.000000e+00> : vector<8x256xf32>
    %19 = tpu.matmul %17, %18, %cst_7 {dimension_numbers = #tpu.dot_dimension_numbers<[1], [0], [0], [1], [0, 0, 1, 1], [], []>, precision = #tpu.contract_precision<fp32>} : vector<8x128xf32>, vector<128x256xf32>, vector<8x256xf32> -> vector<8x256xf32>
    %20 = arith.addf %2, %19 : vector<8x256xf32>
    %c0_8 = arith.constant 0 : index
    %c0_9 = arith.constant 0 : index
    %21 = vector.load %arg5[%c0_8, %c0_9] : memref<8x256xf32, #tpu.memory_space<vmem>>, vector<8x256xf32>
    tpu.vector_store %arg5[%c0_8, %c0_9], %20 {strides = array<i32>} : memref<8x256xf32, #tpu.memory_space<vmem>>, vector<8x256xf32>,
    return
  }
  func.func @transform_0(%arg0: i32) -> (i32, i32) {
    %c0_i32 = arith.constant 0 : i32
    %c0_i32_0 = arith.constant 0 : i32
    return %arg0, %c0_i32 : i32, i32
  }
  func.func @transform_1(%arg0: i32) -> (i32, i32) {
    %c0_i32 = arith.constant 0 : i32
    %c0_i32_0 = arith.constant 0 : i32
    return %arg0, %c0_i32 : i32, i32
  }
  func.func @transform_2(%arg0: i32) -> (i32, i32) {
    %c0_i32 = arith.constant 0 : i32
    %c0_i32_0 = arith.constant 0 : i32
    %c0_i32_1 = arith.constant 0 : i32
    return %c0_i32, %c0_i32_0 : i32, i32
  }
  func.func @transform_3(%arg0: i32) -> (i32, i32) {
    %c0_i32 = arith.constant 0 : i32
    %c0_i32_0 = arith.constant 0 : i32
    %c0_i32_1 = arith.constant 0 : i32
    return %c0_i32, %c0_i32_0 : i32, i32
  }
  func.func @transform_4(%arg0: i32) -> (i32, i32) {
    %c0_i32 = arith.constant 0 : i32
    %c0_i32_0 = arith.constant 0 : i32
    return %arg0, %c0_i32 : i32, i32
  }
}

</mosaic_0001>

<bundles_post_ra>
// kernel: tpu_custom_call.1
= control target key start
LH: loop header
LB: loop body
LE: loop exit
PB: predicated region body
PF: predicated region fallthrough
CT: control target
= control target key end

     0   :  { %9 = vsyncpa [#allocation3], 0  ;;  %s2686_s0 = inlined_call_operand.vmem [shape: f32[16,4], index: 0, kind: input, shape index: {}]   ;;  %s2687_s1 = inlined_call_operand.vmem [shape: s32[16,3], index: 1, kind: input, shape index: {}]   ;;  %s2688_s2 = inlined_call_operand.vmem [shape: f32[4,256], index: 2, kind: input, shape index: {}]   ;;  %s2689_s3 = inlined_call_operand.hbm [shape: f32[128,256], index: 3, kind: input, shape index: {}]   ;;  %s2690_s4 = inlined_call_operand.hbm [shape: f32[16,256], index: 4, kind: output, shape index: {}]  }
   0x1   :  { %10 = vsyncpa [#allocation4], 0 }
   0x2   :  { %12 = vsyncpa [#allocation4 + $0x1], 0  ;;  %s2134_s15 = smov 0   ;;  %s2136_s16 = smov 0  }
   0x3   :  { %s2138_s17 = smov 0   ;;  %s2140_s18 = smov 0  }
   0x4 LB: > { %s2155_s19 = sadd.s32 4294967295, %s2098_s18   ;;  %s1709_s20 = sadd.s32 4294967294, %s2098_s18   ;;  %s2098_s18 = sphi %s2140_s18, %s2796_s18   ;;  %s2094_s17 = sphi %s2138_s17, %s2795_s17   ;;  %s2090_s16 = sphi %s2136_s16, %s2794_s16   ;;  %s2086_s15 = sphi %s2134_s15, %s2793_s15  }
   0x5   : > { %s2159_s21 = sadd.s32 1, %s2098_s18   ;;  %s119_s22 = sadd.s32 1, %s2094_s17 }
   0x6   : > { %s116_s23 = ssub.s32 %s2098_s18, %s2159_s21  ;;  %p129_p0 = scmp.ne.s32.totalorder %s2094_s17, %s2090_s16 }
   0x7   : > { %p117_p1 = scmp.eq.s32.totalorder %s116_s23, 0  ;;  %p130_p2 = scmp.eq.s32.totalorder %s2155_s19, 1 }
   0x8   : > { %p135_p3 = scmp.ne.s32.totalorder %s2090_s16, %s2086_s15  ;;  %p136_p4 = scmp.eq.s32.totalorder %s1709_s20, 1 }
   0x9   : > { %s2170_s24 = scalar_select %p117_p1, %s2094_s17, %s119_s22  }
   0xa   : > { %p2172_p5 = por %p130_p2, %p129_p0  ;;  %p2176_p6 = por %p136_p4, %p135_p3 }
   0xb   : > { %p1710_p7 = scmp.ge.s32.totalorder %s2098_s18, 1  ;;  %p143_p8 = scmp.lt.s32.totalorder %s2098_s18, 3 }
   0xc   : > { %s2712_s25 = scalar_select %p2172_p5, 1, 0 }
   0xd   : > { %s2713_s26 = scalar_select %p2176_p6, 1, 0 }
   0xe   : > { %p2691_p9 = scmp.eq.s32.totalorder %s2155_s19, 0  ;;  %p2183_p10 = pnand %p1710_p7, %p143_p8 }
   0xf   : > { %s2100_s28 = smov [#allocation2]   ;;  %s2004_s7 = scalar_lea.hbm %s2689_s3, 4096 }
  0x10   : > { %s2714_s27 = scalar_select %p2183_p10, 1, 0 }
  0x11   : > { %s158_s29 = sshll.u32 %s2100_s28, 4  ;;  %p1948_p11 = pneg %p2183_p10  ;;  %s159_s29 = int_to_ptr.vmem [resolvable:$true] %s158_s29 }
  0x12   : > { %p2005_p13 = scmp.ne.s32.totalorder %s2689_s3, %s2004_s7  ;;  %p2011_p3 = scmp.lt.u32.totalorder %s2004_s7, %s2689_s3 }
  0x13   : > { %p2191_p12 = pnand %p2691_p9, %p1948_p11 }
  0x15   : > { %p2006_p0 = pneg %p2191_p12 }
  0x17   : > { %p2007_p1 = pnand %p2006_p0, %p2005_p13 }
  0x19   : > { %p2008_p2 = pneg %p2007_p1 }
  0x1b   : > { %p2013_p4 = pnand %p2011_p3, %p2008_p2 }
  0x1d   : > { %2016 = shalt.err (!%p2013_p4)
}
  0x1e   : > { %s2017_s12 = scalar_lea.vmem %s159_s29, 4096  ;;  %p2025_p9 = scmp.lt.s32.totalorder %s159_s29, %s159_s29 }
  0x1f   : > { %p2018_p7 = scmp.ne.s32.totalorder %s159_s29, %s2017_s12  ;;  %p2026_p6 = scmp.lt.s32.totalorder %s2017_s12, %s2017_s12 }
  0x21   : > { %p2020_p8 = pnand %p2018_p7, %p2006_p0  ;;  %p2027_p5 = por %p2026_p6, %p2025_p9 }
  0x23   : > { %p2021_p11 = pneg %p2020_p8 }
  0x25   : > { %p2028_p10 = pnand %p2027_p5, %p2021_p11 }
  0x27   : > { %2031 = shalt.err (!%p2028_p10)
}
  0x28   : > { %s2101_s13 = smov 256   ;;  %s2102_s14 = smov 16  }
  0x29   : > { %1951 = dma.hbm_to_vmem [thread:$0]  (!%p2191_p12), %s2689_s3, 4096, %s159_s29, [#allocation3], %s2101_s13, %s2101_s13, %s2102_s14  }
  0x2a   : > { %p2716_p13 = scmp.ne.s32.totalorder %s2714_s27, 0 }
  0x2c   : > { %188 = sbr.rel (%p2716_p13) target bundleno = 521 (0x209), region = 36 }
  0x33   : > { %p2717_p1 = scmp.eq.s32.totalorder %s2155_s19, 0 }
  0x35   : > { %2077 = dma.done.wait (%p2717_p1), [#allocation3], 4096   ;;  %p2718_p0 = pmov %p2717_p1 }
  0x36   : > { %p217_p5 = scmp.lt.s32.totalorder %s2155_s19, 1  ;;  %v2103_v0 = vmov 0   ;;  %v2104_v1 = vmov 2   ;;  %v247_v3 = vld [vmem:[#allocation2 + $0x8] sm:$0xff]  ;;  %v249_v4 = vld [vmem:[#allocation2 + $0x18] sm:$0xff]  ;;  %v246_v6 = vld [vmem:[#allocation2] sm:$0xff] }
  0x37   : > { %2079 = vsyncadd (%p2718_p0), [#allocation3], 4294963200  ;;  %1999 = vset.pattern.permute.xlu0 %v2103_v0  ;;  %2001 = vset.pattern.permute.xlu1 %v2104_v1  ;;  %v278_v5 = vand.u32 4294901760, %v247_v3  ;;  %v248_v7 = vld [vmem:[#allocation2 + $0x10] sm:$0xff]  ;;  %v282_v8 = vand.u32 4294901760, %v249_v4  ;;  %v280_v9 = vand.u32 4294901760, %v246_v6 }
  0x38   : > { %s2219_s23 = scalar_select %p217_p5, %s2155_s19, 1  ;;  %v284_v10 = vand.u32 4294901760, %v248_v7  ;;  %v251_v11 = vld [vmem:[#allocation2 + $0x28] sm:$0xff]  ;;  %v253_v12 = vld [vmem:[#allocation2 + $0x38] sm:$0xff]  ;;  %v250_v15 = vld [vmem:[#allocation2 + $0x20] sm:$0xff]  ;;  %v2105_v25 = vmov 1  }
  0x39   : > { %v286_v13 = vand.u32 4294901760, %v251_v11  ;;  %v290_v14 = vand.u32 4294901760, %v253_v12  ;;  %v252_v16 = vld [vmem:[#allocation2 + $0x30] sm:$0xff]  ;;  %v255_v17 = vld [vmem:[#allocation2 + $0x48] sm:$0xff]  ;;  %v2228_v18 = vpack.c.bf16 %v282_v8, %v278_v5  ;;  %v2230_v19 = vsub.f32 %v247_v3, %v278_v5  ;;  %v257_v22 = vld [vmem:[#allocation2 + $0x58] sm:$0xff]  ;;  %s214_s10 = sand.u32 1, %s2090_s16  }
  0x3a   : > { %s1716_s27 = sshll.u32 %s2219_s23, 3  ;;  %v2232_v20 = vsub.f32 %v249_v4, %v282_v8  ;;  %v2234_v21 = vpack.c.bf16 %v284_v10, %v280_v9  ;;  %v254_v23 = vld [vmem:[#allocation2 + $0x40] sm:$0xff]  ;;  %v256_v24 = vld [vmem:[#allocation2 + $0x50] sm:$0xff]  ;;  %v2236_v26 = vsub.f32 %v246_v6, %v280_v9  ;;  %v2238_v27 = vsub.f32 %v248_v7, %v284_v10  ;;  %v259_v30 = vld [vmem:[#allocation2 + $0x68] sm:$0xff]  ;;  %s1715_s11 = sshll.u32 %s214_s10, 4 }
  0x3b   : > { %s224_s30 = scalar_lea.vmem %s2687_s1, %s1716_s27  ;;  %2719 = vst [vmem:[#allocation8_spill] sm:$0xff] %v2228_v18  ;;  %v2240_v28 = vpack.c.bf16 %v290_v14, %v286_v13  ;;  %v2242_v29 = vsub.f32 %v251_v11, %v286_v13  ;;  %v261_v31 = vld [vmem:[#allocation2 + $0x78] sm:$0xff]  ;;  %1825 = vmatprep.subr.bf16.mxu0 %v2228_v18  ;;  %v2245_v32 = vsub.f32 %v253_v12, %v290_v14  ;;  %v288_v33 = vand.u32 4294901760, %v250_v15  ;;  %v258_v40 = vld [vmem:[#allocation2 + $0x60] sm:$0xff]  ;;  %v260_v45 = vld [vmem:[#allocation2 + $0x70] sm:$0xff]  ;;  %s220_s9 = scalar_lea.vmem %s2686_s0, %s1716_s27 }
  0x3c   : > { %v227_v2 = vld [vmem:[%s224_s30] sm:$0xff]  ;;  %2720 = vst [vmem:[#allocation9_spill] sm:$0xff] %v2234_v21  ;;  %v292_v34 = vand.u32 4294901760, %v252_v16  ;;  %v294_v35 = vand.u32 4294901760, %v255_v17  ;;  %1827 = vmatpush1.bf16.msra.mxu0 %v2234_v21  ;;  %1729 = vmatprep.subr.bf16.mxu1 %v2228_v18  ;;  %v298_v36 = vand.u32 4294901760, %v257_v22  ;;  %v296_v37 = vand.u32 4294901760, %v254_v23 }
  0x3d   : > { %231 = vperm.xlu0 %1999, %v227_v2   ;;  %240 = vperm.xlu1 %2001, %v227_v2   ;;  %2721 = vst [vmem:[#allocation10_spill] sm:$0xff] %v2240_v28  ;;  %v300_v38 = vand.u32 4294901760, %v256_v24  ;;  %v302_v39 = vand.u32 4294901760, %v259_v30  ;;  %v2253_v42 = vsub.f32 %v250_v15, %v288_v33  ;;  %v306_v44 = vand.u32 4294901760, %v261_v31  ;;  %v263_v46 = vld [vmem:[#allocation2 + $0x88] sm:$0xff]  ;;  %v265_v47 = vld [vmem:[#allocation2 + $0x98] sm:$0xff] }
  0x3e   : > { %1829 = vmatprep.subr.bf16.mxu0 %v2240_v28  ;;  %1731 = vmatpush1.bf16.msra.mxu1 %v2234_v21  ;;  %v2251_v41 = vpack.c.bf16 %v292_v34, %v288_v33  ;;  %v2255_v43 = vsub.f32 %v252_v16, %v292_v34  ;;  %v2258_v48 = vpack.c.bf16 %v298_v36, %v294_v35  ;;  %v262_v52 = vld [vmem:[#allocation2 + $0x80] sm:$0xff]  ;;  %v264_v53 = vld [vmem:[#allocation2 + $0x90] sm:$0xff]  ;;  %v267_v54 = vld [vmem:[#allocation2 + $0xa8] sm:$0xff]  ;;  %v304_v60 = vand.u32 4294901760, %v258_v40  ;;  %s1727_s12 = sshll.u32 %s2155_s19, 8  ;;  %s216_s13 = scalar_lea.vmem [#allocation5], %s1715_s11 }
  0x3f   : > { %1733 = vmatprep.subr.bf16.mxu1 %v2240_v28  ;;  %v2260_v49 = vsub.f32 %v255_v17, %v294_v35  ;;  %v2262_v50 = vsub.f32 %v257_v22, %v298_v36  ;;  %v2264_v51 = vpack.c.bf16 %v300_v38, %v296_v37  ;;  %v2266_v55 = vsub.f32 %v254_v23, %v296_v37  ;;  %v269_v63 = vld [vmem:[#allocation2 + $0xb8] sm:$0xff]  ;;  %v266_v5 = vld [vmem:[#allocation2 + $0xa0] sm:$0xff]  ;;  %v268_v6 = vld [vmem:[#allocation2 + $0xb0] sm:$0xff]  ;;  %s1626_s14 = sshll.u32 %s216_s13, 4  ;;  %s2644_s23 = scalar_lea.hbm %s2690_s4, %s1727_s12  ;;  %s2646_s14 = int_to_ptr.vmem [resolvable:$true] %s1626_s14 }
  0x40   : > { %2722 = vst [vmem:[#allocation11_spill] sm:$0xff] %v2251_v41  ;;  %2723 = vst [vmem:[#allocation12_spill] sm:$0xff] %v2258_v48  ;;  %v2268_v56 = vsub.f32 %v256_v24, %v300_v38  ;;  %v2270_v57 = vpack.c.bf16 %v306_v44, %v302_v39  ;;  %v2272_v58 = vsub.f32 %v259_v30, %v302_v39  ;;  %1831 = vmatpush1.bf16.msra.mxu0 %v2251_v41  ;;  %v271_v10 = vld [vmem:[#allocation2 + $0xc8] sm:$0xff]  ;;  %v273_v11 = vld [vmem:[#allocation2 + $0xd8] sm:$0xff]  ;;  %vm1135_vm5 = vcmask 31744   ;;  %s1612_s27 = scalar_lea.sflag [#allocation4], %s214_s10 }
  0x41   : > { %2000 = vset.pattern.permute.xlu0 %v2105_v25  ;;  %2724 = vst [vmem:[#allocation13_spill] sm:$0xff] %v2264_v51  ;;  %v2276_v59 = vsub.f32 %v261_v31, %v306_v44  ;;  %v308_v61 = vand.u32 4294901760, %v260_v45  ;;  %v310_v62 = vand.u32 4294901760, %v263_v46  ;;  %1833 = vmatprep.subr.bf16.mxu0 %v2258_v48  ;;  %v314_v0 = vand.u32 4294901760, %v265_v47  ;;  %v270_v12 = vld [vmem:[#allocation2 + $0xc0] sm:$0xff]  ;;  %v272_v17 = vld [vmem:[#allocation2 + $0xd0] sm:$0xff] }
  0x42   : > { %235 = vperm.xlu0 %2000, %v227_v2   ;;  %2725 = vst [vmem:[#allocation14_spill] sm:$0xff] %v2270_v57  ;;  %1735 = vmatpush1.bf16.msra.mxu1 %v2251_v41  ;;  %v312_v2 = vand.u32 4294901760, %v262_v52  ;;  %v316_v3 = vand.u32 4294901760, %v264_v53  ;;  %v318_v4 = vand.u32 4294901760, %v267_v54  ;;  %v2283_v7 = vsub.f32 %v258_v40, %v304_v60  ;;  %v275_v39 = vld [vmem:[#allocation2 + $0xe8] sm:$0xff]  ;;  %v277_v40 = vld [vmem:[#allocation2 + $0xf8] sm:$0xff] }
  0x43   : > { %1737 = vmatprep.subr.bf16.mxu1 %v2258_v48  ;;  %v2285_v8 = vsub.f32 %v260_v45, %v308_v61  ;;  %v2287_v9 = vsub.f32 %v263_v46, %v310_v62  ;;  %v2289_v13 = vpack.c.bf16 %v314_v0, %v310_v62  ;;  %v2291_v14 = vsub.f32 %v265_v47, %v314_v0  ;;  %v274_v44 = vld [vmem:[#allocation2 + $0xe0] sm:$0xff]  ;;  %s2032_s28 = scalar_lea.vmem %s2646_s14, 256  ;;  %p2791_p9 = scmp.ne.s32.totalorder %s2712_s25, 0 }
  0x44   : > { %v2293_v15 = vpack.c.bf16 %v316_v3, %v312_v2  ;;  %v2295_v16 = vsub.f32 %v262_v52, %v312_v2  ;;  %1835 = vmatpush1.bf16.msra.mxu0 %v2264_v51  ;;  %v2298_v22 = vsub.f32 %v264_v53, %v316_v3  ;;  %v322_v23 = vand.u32 4294901760, %v269_v63  ;;  %v276_v53 = vld [vmem:[#allocation2 + $0xf0] sm:$0xff]  ;;  %p2033_p6 = scmp.ne.s32.totalorder %s2646_s14, %s2032_s28  ;;  %s2108_s19 = smov [#allocation5]  }
  0x45   : > { %2727 = vst [vmem:[#allocation16_spill] sm:$0xff] %v2289_v13  ;;  %v2300_v24 = vsub.f32 %v267_v54, %v318_v4  ;;  %v320_v25 = vand.u32 4294901760, %v266_v5  ;;  %1837 = vmatprep.subr.bf16.mxu0 %v2270_v57  ;;  %v324_v30 = vand.u32 4294901760, %v268_v6  ;;  %v326_v31 = vand.u32 4294901760, %v271_v10  ;;  %s2036_s29 = sshll.u32 %s2108_s19, 4  ;;  %s2037_s29 = int_to_ptr.vmem [resolvable:$false] %s2036_s29 }
  0x46   : > { %2002 = vset.pattern.permute.xlu0 %v2104_v1  ;;  %v2281_v1 = vpack.c.bf16 %v308_v61, %v304_v60  ;;  %2728 = vst [vmem:[#allocation17_spill] sm:$0xff] %v2293_v15  ;;  %1739 = vmatpush1.bf16.msra.mxu1 %v2264_v51  ;;  %v330_v33 = vand.u32 4294901760, %v273_v11  ;;  %v328_v34 = vand.u32 4294901760, %v270_v12  ;;  %v2305_v35 = vpack.c.bf16 %v322_v23, %v318_v4  ;;  %p2034_p10 = pnand %p2033_p6, %p2791_p9  ;;  %s2038_s30 = scalar_lea.vmem %s2037_s29, 512 }
  0x47   : > { %1741 = vmatprep.subr.bf16.mxu1 %v2270_v57  ;;  %v2307_v36 = vsub.f32 %v269_v63, %v322_v23  ;;  %v2309_v37 = vsub.f32 %v266_v5, %v320_v25  ;;  %v332_v38 = vand.u32 4294901760, %v272_v17  ;;  %v2311_v45 = vpack.c.bf16 %v324_v30, %v320_v25  ;;  %p2039_p2 = scmp.lt.s32.totalorder %s2646_s14, %s2037_s29  ;;  %p2040_p3 = scmp.lt.s32.totalorder %s2038_s30, %s2032_s28 }
  0x48   : > { %2726 = vst [vmem:[#allocation15_spill] sm:$0xff] %v2281_v1  ;;  %2729 = vst [vmem:[#allocation18_spill] sm:$0xff] %v2305_v35  ;;  %v2313_v46 = vsub.f32 %v268_v6, %v324_v30  ;;  %v2315_v47 = vpack.c.bf16 %v330_v33, %v326_v31  ;;  %v2317_v52 = vsub.f32 %v271_v10, %v326_v31  ;;  %1839 = vmatpush1.bf16.msra.mxu0 %v2281_v1  ;;  %v2694_v4 = vmov 0.0   ;;  %p2035_p12 = pneg %p2034_p10 }
  0x49   : > { %2730 = vst [vmem:[#allocation19_spill] sm:$0xff] %v2311_v45  ;;  %v2320_v54 = vsub.f32 %v273_v11, %v330_v33  ;;  %v2322_v60 = vpack.c.bf16 %v332_v38, %v328_v34  ;;  %v2324_v61 = vsub.f32 %v270_v12, %v328_v34  ;;  %v2326_v62 = vsub.f32 %v272_v17, %v332_v38  ;;  %p2041_p4 = por %p2040_p3, %p2039_p2 }
  0x4a   : > { %2731 = vst [vmem:[#allocation20_spill] sm:$0xff] %v2315_v47  ;;  %1841 = vmatprep.subr.bf16.mxu0 %v2289_v13  ;;  %1743 = vmatpush1.bf16.msra.mxu1 %v2281_v1  ;;  %v334_v63 = vand.u32 4294901760, %v275_v39  ;;  %v338_v0 = vand.u32 4294901760, %v277_v40  ;;  %v336_v2 = vand.u32 4294901760, %v274_v44  ;;  %v340_v3 = vand.u32 4294901760, %v276_v53 }
  0x4b   : > { %2732 = vst [vmem:[#allocation21_spill] sm:$0xff] %v2322_v60  ;;  %1745 = vmatprep.subr.bf16.mxu1 %v2289_v13  ;;  %851 = vmatprep.mubr.f32.mxu0 %v2694_v4  ;;  %v388_v5 = vand.u32 4294901760, %v2230_v19  ;;  %v400_v6 = vand.u32 4294901760, %v2232_v20  ;;  %v394_v10 = vand.u32 4294901760, %v2236_v26  ;;  %v406_v33 = vand.u32 4294901760, %v2238_v27  ;;  %p2042_p7 = pnand %p2041_p4, %p2035_p12 }
  0x4c   : > { %v2335_v11 = vpack.c.bf16 %v338_v0, %v334_v63  ;;  %v2337_v12 = vsub.f32 %v275_v39, %v334_v63  ;;  %v2339_v17 = vsub.f32 %v277_v40, %v338_v0  ;;  %v2341_v23 = vsub.f32 %v274_v44, %v336_v2  ;;  %374 = vmatprep.mubr.f32.mxu1 %v2694_v4 }
  0x4d   : > { %1843 = vmatpush1.bf16.msra.mxu0 %v2293_v15  ;;  %v2345_v25 = vpack.c.bf16 %v340_v3, %v336_v2  ;;  %v2347_v30 = vsub.f32 %v276_v53, %v340_v3  ;;  %v1856_v31 = vpack.c.bf16 %v400_v6, %v388_v5  ;;  %v389_v34 = vsub.f32 %v2230_v19, %v388_v5 }
  0x4e   : > { %2733 = vst [vmem:[#allocation22_spill] sm:$0xff] %v2335_v11  ;;  %1845 = vmatprep.subr.bf16.mxu0 %v2305_v35  ;;  %1747 = vmatpush1.bf16.msra.mxu1 %v2293_v15  ;;  %v401_v38 = vsub.f32 %v2232_v20, %v400_v6  ;;  %v412_v39 = vand.u32 4294901760, %v2242_v29  ;;  %v424_v40 = vand.u32 4294901760, %v2245_v32  ;;  %v2357_v44 = vpack.c.bf16 %v406_v33, %v394_v10 }
  0x4f   : > { %2734 = vst [vmem:[#allocation23_spill] sm:$0xff] %v2345_v25  ;;  %1749 = vmatprep.subr.bf16.mxu1 %v2305_v35  ;;  %v395_v53 = vsub.f32 %v2236_v26, %v394_v10  ;;  %v407_v63 = vsub.f32 %v2238_v27, %v406_v33  ;;  %v418_v0 = vand.u32 4294901760, %v2253_v42  ;;  %v390_v2 = vand.u32 4294901760, %v389_v34 }
  0x50   : > { %v402_v3 = vand.u32 4294901760, %v401_v38  ;;  %v2362_v4 = vpack.c.bf16 %v424_v40, %v412_v39  ;;  %v430_v5 = vand.u32 4294901760, %v2255_v43  ;;  %v413_v35 = vsub.f32 %v2242_v29, %v412_v39 }
  0x51   : > { %1847 = vmatpush1.bf16.msra.mxu0 %v2311_v45  ;;  %v396_v6 = vand.u32 4294901760, %v395_v53  ;;  %v408_v15 = vand.u32 4294901760, %v407_v63  ;;  %v425_v13 = vsub.f32 %v2245_v32, %v424_v40  ;;  %v436_v34 = vand.u32 4294901760, %v2260_v49 }
  0x52   : > { %1849 = vmatprep.subr.bf16.mxu0 %v2315_v47  ;;  %1751 = vmatpush1.bf16.msra.mxu1 %v2311_v45  ;;  %v1760_v10 = vpack.c.bf16 %v402_v3, %v390_v2  ;;  %v2370_v33 = vpack.c.bf16 %v430_v5, %v418_v0  ;;  %v448_v38 = vand.u32 4294901760, %v2262_v50  ;;  %v414_v53 = vand.u32 4294901760, %v413_v35 }
  0x53   : > { %1753 = vmatprep.subr.bf16.mxu1 %v2315_v47  ;;  %v2375_v1 = vpack.c.bf16 %v408_v15, %v396_v6  ;;  %v426_v63 = vand.u32 4294901760, %v425_v13  ;;  %v419_v39 = vsub.f32 %v2253_v42, %v418_v0  ;;  %v431_v57 = vsub.f32 %v2255_v43, %v430_v5 }
  0x54   : > { %v2378_v40 = vpack.c.bf16 %v448_v38, %v436_v34  ;;  %v442_v2 = vand.u32 4294901760, %v2266_v55  ;;  %v454_v3 = vand.u32 4294901760, %v2268_v56  ;;  %v437_v15 = vsub.f32 %v2260_v49, %v436_v34 }
  0x55   : > { %1851 = vmatpush1.bf16.msra.mxu0 %v2322_v60  ;;  %v2384_v45 = vpack.c.bf16 %v426_v63, %v414_v53  ;;  %v420_v51 = vand.u32 4294901760, %v419_v39  ;;  %v449_v35 = vsub.f32 %v2262_v50, %v448_v38  ;;  %v432_v13 = vand.u32 4294901760, %v431_v57 }
  0x56   : > { %1853 = vmatprep.subr.bf16.mxu0 %v2335_v11  ;;  %1755 = vmatpush1.bf16.msra.mxu1 %v2322_v60  ;;  %v2390_v0 = vpack.c.bf16 %v454_v3, %v442_v2  ;;  %v460_v5 = vand.u32 4294901760, %v2272_v58  ;;  %v472_v6 = vand.u32 4294901760, %v2276_v59  ;;  %v438_v53 = vand.u32 4294901760, %v437_v15 }
  0x57   : > { %1757 = vmatprep.subr.bf16.mxu1 %v2335_v11  ;;  %v450_v63 = vand.u32 4294901760, %v449_v35  ;;  %v443_v39 = vsub.f32 %v2266_v55, %v442_v2  ;;  %v455_v34 = vsub.f32 %v2268_v56, %v454_v3  ;;  %v2397_v38 = vpack.c.bf16 %v432_v13, %v420_v51 }
  0x58   : > { %v2399_v47 = vpack.c.bf16 %v472_v6, %v460_v5  ;;  %v466_v57 = vand.u32 4294901760, %v2283_v7  ;;  %v478_v60 = vand.u32 4294901760, %v2285_v8  ;;  %v461_v15 = vsub.f32 %v2272_v58, %v460_v5 }
  0x59   : > { %1855 = vmatpush1.bf16.msra.mxu0 %v2345_v25  ;;  %v2404_v48 = vpack.c.bf16 %v450_v63, %v438_v53  ;;  %v444_v41 = vand.u32 4294901760, %v443_v39  ;;  %v456_v11 = vand.u32 4294901760, %v455_v34  ;;  %v473_v51 = vsub.f32 %v2276_v59, %v472_v6 }
  0x5a   : > { %1857 = vmatprep.subr.bf16.mxu0 %v1856_v31  ;;  %1759 = vmatpush1.bf16.msra.mxu1 %v2345_v25  ;;  %v2408_v2 = vpack.c.bf16 %v478_v60, %v466_v57  ;;  %v484_v3 = vand.u32 4294901760, %v2287_v9  ;;  %v496_v35 = vand.u32 4294901760, %v2291_v14  ;;  %v462_v53 = vand.u32 4294901760, %v461_v15 }
  0x5b   : > { %1761 = vmatprep.subr.bf16.mxu1 %v1760_v10  ;;  %v2413_v13 = vpack.c.bf16 %v456_v11, %v444_v41  ;;  %v467_v63 = vsub.f32 %v2283_v7, %v466_v57  ;;  %v479_v39 = vsub.f32 %v2285_v8, %v478_v60  ;;  %v474_v5 = vand.u32 4294901760, %v473_v51 }
  0x5c   : > { %v2417_v31 = vpack.c.bf16 %v496_v35, %v484_v3  ;;  %v490_v34 = vand.u32 4294901760, %v2295_v16  ;;  %v502_v25 = vand.u32 4294901760, %v2298_v22  ;;  %v485_v21 = vsub.f32 %v2287_v9, %v484_v3 }
  0x5d   : > { %v468_v6 = vand.u32 4294901760, %v467_v63  ;;  %v480_v28 = vand.u32 4294901760, %v479_v39  ;;  %v497_v10 = vsub.f32 %v2291_v14, %v496_v35  ;;  %v2423_v41 = vpack.c.bf16 %v474_v5, %v462_v53 }
  0x5e   : > { %2735 = vst [vmem:[#allocation24_spill] sm:$0xff] %v2417_v31  ;;  %v2425_v11 = vpack.c.bf16 %v502_v25, %v490_v34  ;;  %v508_v57 = vand.u32 4294901760, %v2300_v24  ;;  %v520_v60 = vand.u32 4294901760, %v2307_v36  ;;  %v486_v51 = vand.u32 4294901760, %v485_v21 }
  0x5f   : > { %2736 = vst [vmem:[#allocation25_spill] sm:$0xff] %v2423_v41  ;;  %v2429_v15 = vpack.c.bf16 %v480_v28, %v468_v6  ;;  %v498_v18 = vand.u32 4294901760, %v497_v10  ;;  %v491_v31 = vsub.f32 %v2295_v16, %v490_v34  ;;  %v503_v3 = vsub.f32 %v2298_v22, %v502_v25 }
  0x60   : > { %2737 = vst [vmem:[#allocation26_spill] sm:$0xff] %v2425_v11  ;;  %v2432_v63 = vpack.c.bf16 %v520_v60, %v508_v57  ;;  %v514_v35 = vand.u32 4294901760, %v2309_v37  ;;  %v526_v53 = vand.u32 4294901760, %v2313_v46  ;;  %v509_v11 = vsub.f32 %v2300_v24, %v508_v57 }
  0x61   : > { %2738 = vst [vmem:[#allocation27_spill] sm:$0xff] %v2429_v15  ;;  %v2437_v39 = vpack.c.bf16 %v498_v18, %v486_v51  ;;  %v492_v5 = vand.u32 4294901760, %v491_v31  ;;  %v521_v28 = vsub.f32 %v2307_v36, %v520_v60  ;;  %v504_v6 = vand.u32 4294901760, %v503_v3 }
  0x62   : > { %2739 = vst [vmem:[#allocation28_spill] sm:$0xff] %v2432_v63  ;;  %v2441_v21 = vpack.c.bf16 %v526_v53, %v514_v35  ;;  %v532_v34 = vand.u32 4294901760, %v2317_v52  ;;  %v544_v10 = vand.u32 4294901760, %v2320_v54  ;;  %v510_v63 = vand.u32 4294901760, %v509_v11 }
  0x63   : > { %2740 = vst [vmem:[#allocation29_spill] sm:$0xff] %v2437_v39  ;;  %v522_v25 = vand.u32 4294901760, %v521_v28  ;;  %v515_v15 = vsub.f32 %v2309_v37, %v514_v35  ;;  %v527_v41 = vsub.f32 %v2313_v46, %v526_v53  ;;  %v2447_v18 = vpack.c.bf16 %v504_v6, %v492_v5 }
  0x64   : > { %2741 = vst [vmem:[#allocation30_spill] sm:$0xff] %v2441_v21  ;;  %v2449_v31 = vpack.c.bf16 %v544_v10, %v532_v34  ;;  %v538_v57 = vand.u32 4294901760, %v2324_v61  ;;  %v550_v60 = vand.u32 4294901760, %v2326_v62  ;;  %v533_v39 = vsub.f32 %v2317_v52, %v532_v34 }
  0x65   : > { %2742 = vst [vmem:[#allocation31_spill] sm:$0xff] %v2447_v18  ;;  %v2453_v51 = vpack.c.bf16 %v522_v25, %v510_v63  ;;  %v516_v3 = vand.u32 4294901760, %v515_v15  ;;  %v528_v21 = vand.u32 4294901760, %v527_v41  ;;  %v545_v35 = vsub.f32 %v2320_v54, %v544_v10 }
  0x66   : > { %2743 = vst [vmem:[#allocation32_spill] sm:$0xff] %v2449_v31  ;;  %v2456_v11 = vpack.c.bf16 %v550_v60, %v538_v57  ;;  %v556_v53 = vand.u32 4294901760, %v2337_v12  ;;  %v568_v5 = vand.u32 4294901760, %v2339_v17  ;;  %v534_v6 = vand.u32 4294901760, %v533_v39 }
  0x67   : > { %2744 = vst [vmem:[#allocation33_spill] sm:$0xff] %v2453_v51  ;;  %v2461_v28 = vpack.c.bf16 %v528_v21, %v516_v3  ;;  %v539_v31 = vsub.f32 %v2324_v61, %v538_v57  ;;  %v551_v63 = vsub.f32 %v2326_v62, %v550_v60  ;;  %v546_v25 = vand.u32 4294901760, %v545_v35 }
  0x68   : > { %2745 = vst [vmem:[#allocation34_spill] sm:$0xff] %v2456_v11  ;;  %v2465_v15 = vpack.c.bf16 %v568_v5, %v556_v53  ;;  %v562_v41 = vand.u32 4294901760, %v2341_v23  ;;  %v574_v34 = vand.u32 4294901760, %v2347_v30  ;;  %v557_v51 = vsub.f32 %v2337_v12, %v556_v53 }
  0x69   : > { %2746 = vst [vmem:[#allocation35_spill] sm:$0xff] %v2461_v28  ;;  %v540_v11 = vand.u32 4294901760, %v539_v31  ;;  %v552_v10 = vand.u32 4294901760, %v551_v63  ;;  %v569_v18 = vsub.f32 %v2339_v17, %v568_v5  ;;  %v2471_v21 = vpack.c.bf16 %v546_v25, %v534_v6 }
  0x6a   : > { %2747 = vst [vmem:[#allocation36_spill] sm:$0xff] %v2465_v15  ;;  %v2473_v39 = vpack.c.bf16 %v574_v34, %v562_v41  ;;  %v563_v57 = vsub.f32 %v2341_v23, %v562_v41  ;;  %v558_v3 = vand.u32 4294901760, %v557_v51  ;;  %v575_v15 = vsub.f32 %v2347_v30, %v574_v34 }
  0x6b   : > { %v2476_v60 = vpack.c.bf16 %v552_v10, %v540_v11  ;;  %v570_v35 = vand.u32 4294901760, %v569_v18  ;;  %v1792_v31 = vpack.c.bf16 %v2232_v20, %v2230_v19  ;;  %v1794_v53 = vpack.c.bf16 %v2238_v27, %v2236_v26  ;;  %v2769_v19 = vld [vmem:[#allocation13_spill] sm:$0xff]  ;;  %v2770_v20 = vld [vmem:[#allocation14_spill] sm:$0xff] }
  0x6c   : > { %v564_v28 = vand.u32 4294901760, %v563_v57  ;;  %v1796_v5 = vpack.c.bf16 %v2245_v32, %v2242_v29  ;;  %v576_v63 = vand.u32 4294901760, %v575_v15  ;;  %v1798_v11 = vpack.c.bf16 %v2255_v43, %v2253_v42  ;;  %v226_v26 = vld [vmem:[%s2688_s2] sm:$0xff]  ;;  %v2772_v29 = vld [vmem:[#allocation15_spill] sm:$0xff] }
  0x6d   : > { %v1788_v6 = vpack.c.bf16 %v570_v35, %v558_v3  ;;  %v1800_v18 = vpack.c.bf16 %v2262_v50, %v2260_v49  ;;  %v228_v34 = vlaneseq  ;;  %v2750_v35 = vmov 0.0   ;;  %v225_v42 = vld [vmem:[%s220_s9] sm:$0xff]  ;;  %v2774_v49 = vld [vmem:[#allocation16_spill] sm:$0xff] }
  0x6e   : > { %v1790_v25 = vpack.c.bf16 %v576_v63, %v564_v28  ;;  %v2771_v27 = vpack.c.bf16 %v2268_v56, %v2266_v55  ;;  %v1134_v32 = vcombine.high %v226_v26, %v226_v26  ;;  %v2773_v43 = vpack.c.bf16 %v2276_v59, %v2272_v58 }
  0x6f   : > { %v229_v41 = vand.u32 127, %v228_v34  ;;  %vm1139_vm6 = vcmask 1043456   ;;  %v1137_v50 = vsel %vm1135_vm5, %v225_v42, 0  ;;  %v2777_v56 = vpack.c.bf16 %v2291_v14, %v2287_v9 }
  0x70   : > { %v1142_v55 = vsel %vm1139_vm6, %v1134_v32, 0  ;;  %v1140_v59 = vsel %vm1139_vm6, %v226_v26, 0 }
  0x71   : > { %v1144_v58 = vand.u32 4294901760, %v1142_v55  ;;  %v1146_v9 = vand.u32 4294901760, %v1140_v59 }
  0xbc   : > { %v232_v15 = vpop.permute.xlu0 %231  ;;  %v241_v51 = vpop.permute.xlu1 %240 }
  0xbd   : > { %vm242_vm0 = vcmp.eq.s32.totalorder %v229_v41, %v241_v51  ;;  %vm233_vm1 = vcmp.eq.s32.totalorder %v229_v41, %v232_v15  ;;  %v2107_v15 = vmov 1.0  }
  0xc1   : > { %v236_v57 = vpop.permute.xlu0 %235 }
  0xc2   : > { %vm237_vm2 = vcmp.eq.s32.totalorder %v229_v41, %v236_v57  ;;  %v2763_v41 = vld [vmem:[#allocation36_spill] sm:$0xff]  ;;  %v2765_v57 = vld [vmem:[#allocation9_spill] sm:$0xff] }
  0xc3   : > { %vm238_vm3 = vmor %vm233_vm1, %vm237_vm2 }
  0xc4   : > { %vm2511_vm4 = vmor %vm238_vm3, %vm242_vm0 }
  0xc5   : > { %v1718_v63 = vsel %vm2511_vm4, 1.0, %v2750_v35 }
  0xc6   : > { %v2518_v3 = vsub.f32 %v1718_v63, %v1718_v63  ;;  %v2783_v63 = vpack.c.bf16 %v2313_v46, %v2309_v37  ;;  %v2789_v37 = vpack.c.bf16 %v2339_v17, %v2337_v12 }
  0xc8   : > { %v377_v10 = vand.u32 4294901760, %v2518_v3 }
  0xca   : > { %855 = vmatmul.mubr.f32.vlgmr.msra.gmra.mrb[0].mxu0 %v377_v10  ;;  %v378_v34 = vsub.f32 %v2518_v3, %v377_v10  ;;  %v2764_v10 = vld [vmem:[#allocation8_spill] sm:$0xff] }
  0xcb   : > { %1859 = vmatpush1.bf16.msra.mxu0 %v2357_v44  ;;  %1021 = vmatprep.mubr.f32.mxu0 %v2750_v35  ;;  %v2754_v44 = vld [vmem:[#allocation26_spill] sm:$0xff] }
  0xcc   : > { %1861 = vmatprep.subr.bf16.mxu0 %v2362_v4  ;;  %v379_v51 = vand.u32 4294901760, %v378_v34  ;;  %v2752_v4 = vld [vmem:[#allocation24_spill] sm:$0xff]  ;;  %v2784_v34 = vld [vmem:[#allocation21_spill] sm:$0xff] }
  0xce   : > { %380 = vmatmul.mubr.f32.vlgmr.msra.gmra.mrb[0].mxu1 %v379_v51  ;;  %v1229_v51 = vsub.f32 %v1140_v59, %v1146_v9 }
  0xcf   : > { %1763 = vmatpush1.bf16.msra.mxu1 %v2375_v1  ;;  %1863 = vmatpush1.bf16.msra.mxu0 %v2370_v33  ;;  %v2751_v1 = vld [vmem:[#allocation25_spill] sm:$0xff] }
  0xd0   : > { %1765 = vmatprep.subr.bf16.mxu1 %v2384_v45  ;;  %1865 = vmatprep.subr.bf16.mxu0 %v2378_v40  ;;  %v2753_v45 = vld [vmem:[#allocation27_spill] sm:$0xff]  ;;  %v2755_v33 = vld [vmem:[#allocation29_spill] sm:$0xff]  ;;  %v2756_v40 = vld [vmem:[#allocation28_spill] sm:$0xff] }
  0xd1   : > { %610 = vmatprep.mubr.f32.mxu1 %v2750_v35 }
  0xd3   : > { %1767 = vmatpush1.bf16.msra.mxu1 %v2397_v38  ;;  %1867 = vmatpush1.bf16.msra.mxu0 %v2390_v0  ;;  %v2757_v0 = vld [vmem:[#allocation31_spill] sm:$0xff]  ;;  %v2760_v38 = vld [vmem:[#allocation32_spill] sm:$0xff] }
  0xd4   : > { %1769 = vmatprep.subr.bf16.mxu1 %v2404_v48  ;;  %1869 = vmatprep.subr.bf16.mxu0 %v2399_v47  ;;  %v2758_v48 = vld [vmem:[#allocation30_spill] sm:$0xff]  ;;  %v2759_v47 = vld [vmem:[#allocation33_spill] sm:$0xff] }
  0xd7   : > { %1771 = vmatpush1.bf16.msra.mxu1 %v2413_v13  ;;  %1871 = vmatpush1.bf16.msra.mxu0 %v2408_v2  ;;  %v2761_v2 = vld [vmem:[#allocation35_spill] sm:$0xff]  ;;  %v2762_v13 = vld [vmem:[#allocation34_spill] sm:$0xff] }
  0xd8   : > { %1773 = vmatprep.subr.bf16.mxu1 %v2751_v1  ;;  %1873 = vmatprep.subr.bf16.mxu0 %v2752_v4  ;;  %v2787_v1 = vpack.c.bf16 %v2326_v62, %v2324_v61  ;;  %v2788_v4 = vld [vmem:[#allocation23_spill] sm:$0xff] }
  0xdb   : > { %1775 = vmatpush1.bf16.msra.mxu1 %v2753_v45  ;;  %1875 = vmatpush1.bf16.msra.mxu0 %v2754_v44  ;;  %v1230_v45 = vand.u32 4294901760, %v1229_v51 }
  0xdc   : > { %1777 = vmatprep.subr.bf16.mxu1 %v2755_v33  ;;  %1877 = vmatprep.subr.bf16.mxu0 %v2756_v40 }
  0xdd   : > { %v1231_v61 = vsub.f32 %v1229_v51, %v1230_v45 }
  0xdf   : > { %1779 = vmatpush1.bf16.msra.mxu1 %v2757_v0  ;;  %1879 = vmatpush1.bf16.msra.mxu0 %v2758_v48  ;;  %v1232_v17 = vand.u32 4294901760, %v1231_v61 }
  0xe0   : > { %1781 = vmatprep.subr.bf16.mxu1 %v2759_v47  ;;  %1881 = vmatprep.subr.bf16.mxu0 %v2760_v38 }
  0xe3   : > { %1783 = vmatpush1.bf16.msra.mxu1 %v2761_v2  ;;  %1883 = vmatpush1.bf16.msra.mxu0 %v2762_v13 }
  0xe4   : > { %1785 = vmatprep.subr.bf16.mxu1 %v2471_v21  ;;  %1885 = vmatprep.subr.bf16.mxu0 %v2763_v41  ;;  %v2766_v21 = vld [vmem:[#allocation10_spill] sm:$0xff] }
  0xe7   : > { %1787 = vmatpush1.bf16.msra.mxu1 %v2476_v60  ;;  %1887 = vmatpush1.bf16.msra.mxu0 %v2473_v39  ;;  %v2767_v39 = vld [vmem:[#allocation11_spill] sm:$0xff]  ;;  %v2768_v60 = vld [vmem:[#allocation12_spill] sm:$0xff] }
  0xe8   : > { %1789 = vmatprep.subr.bf16.mxu1 %v1788_v6  ;;  %1889 = vmatprep.subr.bf16.mxu0 %v2764_v10  ;;  %v1211_v6 = vand.u32 4294901760, %v1137_v50 }
  0xea   : > { %1720 = vmatmul.mubr.msk.f32.vlgmr.msra.gmra.mrb[0].mxu0 %vm2511_vm4, %v2107_v15  ;;  %v1212_v14 = vsub.f32 %v1137_v50, %v1211_v6 }
  0xeb   : > { %1791 = vmatpush1.bf16.msra.mxu1 %v1790_v25  ;;  %1891 = vmatpush1.bf16.msra.mxu0 %v2765_v57  ;;  %v1223_v25 = vsub.f32 %v1142_v55, %v1144_v58 }
  0xec   : > { %1793 = vmatprep.subr.bf16.mxu1 %v1792_v31  ;;  %1893 = vmatprep.subr.bf16.mxu0 %v2766_v21  ;;  %v2775_v31 = vpack.c.bf16 %v2285_v8, %v2283_v7  ;;  %v2781_v7 = vpack.c.bf16 %v2307_v36, %v2300_v24  ;;  %v2782_v8 = vld [vmem:[#allocation20_spill] sm:$0xff]  ;;  %v1213_v36 = vand.u32 4294901760, %v1212_v14 }
  0xed   : > { %1125 = vmatprep.mubr.f32.mxu0 %v2750_v35  ;;  %v1224_v24 = vand.u32 4294901760, %v1223_v25 }
  0xee   : > { %1719 = vmatmul.mubr.msk.f32.vlgmr.msra.gmra.mrb[0].mxu1 %vm2511_vm4, %v2107_v15 }
  0xef   : > { %1795 = vmatpush1.bf16.msra.mxu1 %v1794_v53  ;;  %1895 = vmatpush1.bf16.msra.mxu0 %v2767_v39  ;;  %v2776_v53 = vld [vmem:[#allocation17_spill] sm:$0xff]  ;;  %v1225_v46 = vsub.f32 %v1223_v25, %v1224_v24 }
  0xf0   : > { %1797 = vmatprep.subr.bf16.mxu1 %v1796_v5  ;;  %1897 = vmatprep.subr.bf16.mxu0 %v2768_v60  ;;  %v2778_v5 = vld [vmem:[#allocation18_spill] sm:$0xff] }
  0xf1   : > { %746 = vmatprep.mubr.f32.mxu1 %v2750_v35  ;;  %v1226_v62 = vand.u32 4294901760, %v1225_v46 }
  0xf3   : > { %1799 = vmatpush1.bf16.msra.mxu1 %v1798_v11  ;;  %1899 = vmatpush1.bf16.msra.mxu0 %v2769_v19  ;;  %v2779_v11 = vpack.c.bf16 %v2298_v22, %v2295_v16  ;;  %v2785_v16 = vpack.c.bf16 %v2320_v54, %v2317_v52  ;;  %v2786_v22 = vld [vmem:[#allocation22_spill] sm:$0xff]  ;;  %v1214_v52 = vsub.f32 %v1212_v14, %v1213_v36 }
  0xf4   : > { %1801 = vmatprep.subr.bf16.mxu1 %v1800_v18  ;;  %1901 = vmatprep.subr.bf16.mxu0 %v2770_v20  ;;  %v2780_v18 = vld [vmem:[#allocation19_spill] sm:$0xff]  ;;  %v2790_v54 = vpack.c.bf16 %v2347_v30, %v2341_v23 }
  0xf5   : > { %v1215_v12 = vand.u32 4294901760, %v1214_v52 }
  0xf7   : > { %1803 = vmatpush1.bf16.msra.mxu1 %v2771_v27  ;;  %1903 = vmatpush1.bf16.msra.mxu0 %v2772_v29 }
  0xf8   : > { %1805 = vmatprep.subr.bf16.mxu1 %v2773_v43  ;;  %1905 = vmatprep.subr.bf16.mxu0 %v2774_v49 }
  0xfb   : > { %1807 = vmatpush1.bf16.msra.mxu1 %v2775_v31  ;;  %1907 = vmatpush1.bf16.msra.mxu0 %v2776_v53 }
  0xfc   : > { %1809 = vmatprep.subr.bf16.mxu1 %v2777_v56  ;;  %1909 = vmatprep.subr.bf16.mxu0 %v2778_v5 }
  0xff   : > { %1811 = vmatpush1.bf16.msra.mxu1 %v2779_v11  ;;  %1911 = vmatpush1.bf16.msra.mxu0 %v2780_v18 }
 0x100   : > { %1813 = vmatprep.subr.bf16.mxu1 %v2781_v7  ;;  %1913 = vmatprep.subr.bf16.mxu0 %v2782_v8 }
 0x103   : > { %1815 = vmatpush1.bf16.msra.mxu1 %v2783_v63  ;;  %1915 = vmatpush1.bf16.msra.mxu0 %v2784_v34 }
 0x104   : > { %1817 = vmatprep.subr.bf16.mxu1 %v2785_v16  ;;  %1917 = vmatprep.subr.bf16.mxu0 %v2786_v22 }
 0x107   : > { %1819 = vmatpush1.bf16.msra.mxu1 %v2787_v1  ;;  %1919 = vmatpush1.bf16.msra.mxu0 %v2788_v4 }
 0x108   : > { %1821 = vmatprep.subr.bf16.mxu1 %v2789_v37  ;;  %1382 = vmatprep.subr.mxu0 %v1144_v58 }
 0x10a   : > { %1721 = vmatmul.mubr.msk.f32.vlgmr.msra.gmra.mrb[0].mxu0 %vm2511_vm4, %v2107_v15 }
 0x10b   : > { %1823 = vmatpush1.bf16.msra.mxu1 %v2790_v54  ;;  %1384 = vmatpush1.msra.mxu0 %v1146_v9 }
 0x10c   : > { %1447 = vmatprep.mubr.f32.mxu0 %v2750_v35  ;;  %1145 = vmatprep.subr.mxu1 %v1144_v58 }
 0x10d   : > { %1460 = vmatprep.subr.mxu0 %v1224_v24 }
 0x10e   : > { %749 = vmatmul.mubr.f32.vlgmr.msra.gmra.mrb[0].mxu1 %v2518_v3  ;;  %1451 = vmatmul.mubr.f32.vlgmr.msra.gmra.mrb[2].mxu0 %v1213_v36 }
 0x10f   : > { %1147 = vmatpush1.msra.mxu1 %v1146_v9  ;;  %1210 = vmatprep.mubr.f32.mxu1 %v2750_v35 }
 0x110   : > { %1227 = vmatprep.subr.mxu1 %v1226_v62  ;;  %1464 = vmatpush1.msra.mxu0 %v1230_v45 }
 0x111   : > { %1527 = vmatprep.mubr.f32.mxu0 %v2750_v35  ;;  %1536 = vmatprep.subr.mxu0 %v1144_v58 }
 0x112   : > { %1216 = vmatmul.mubr.f32.vlgmr.msra.gmra.mrb[2].mxu1 %v1215_v12 }
 0x113   : > { %1233 = vmatpush1.msra.mxu1 %v1232_v17  ;;  %1296 = vmatprep.mubr.f32.mxu1 %v2750_v35 }
 0x114   : > { %1306 = vmatprep.subr.mxu1 %v1223_v25 }
 0x116   : > { %1529 = vmatmul.mubr.f32.vlgmr.msra.gmra.mrb[2].mxu0 %v1211_v6 }
 0x117   : > { %1538 = vmatpush1.msra.mxu0 %v1146_v9  ;;  %1601 = vmatprep.mubr.f32.mxu0 %v2750_v35 }
 0x11a   : > { %1298 = vmatmul.mubr.f32.vlgmr.msra.gmra.mrb[2].mxu1 %v1211_v6 }
 0x11b   : > { %1309 = vmatpush1.msra.mxu1 %v1229_v51  ;;  %1372 = vmatprep.mubr.f32.mxu1 %v2750_v35 }
 0x11e   : > { %1603 = vmatmul.mubr.f32.vlgmr.msra.gmra.mrb[2].mxu0 %v1211_v6 }
 0x122   : > { %1375 = vmatmul.mubr.f32.vlgmr.msra.gmra.mrb[2].mxu1 %v1212_v14 }
 0x1dd   : > { %v1128_v23 = vpop.f32.mrb[0].mxu0 }
 0x1de   : > { %v1130_v30 = vpop.f32.mrb[1].mxu0 }
 0x1e1   : > { %v750_v3 = vpop.f32.mrb[0].mxu1 }
 0x1e2   : > { %v1920_v28 = vadd.f32 %v1128_v23, %v750_v3  ;;  %v752_v44 = vpop.f32.mrb[1].mxu1 }
 0x1e3   : > { %v1923_v33 = vadd.f32 %v1130_v30, %v752_v44 }
 0x1f1   : > { %v1604_v40 = vpop.f32.mrb[2].mxu0 }
 0x1f2   : > { %v1606_v0 = vpop.f32.mrb[3].mxu0 }
 0x1f5   : > { %v1376_v48 = vpop.f32.mrb[2].mxu1 }
 0x1f6   : > { %v1921_v47 = vadd.f32 %v1920_v28, %v1376_v48  ;;  %v1378_v38 = vpop.f32.mrb[3].mxu1 }
 0x1f7   : > { %v1924_v35 = vadd.f32 %v1923_v33, %v1378_v38 }
 0x1f8   : > { %v1922_v2 = vadd.f32 %v1921_v47, %v1604_v40 }
 0x1f9   : > { %v1925_v13 = vadd.f32 %v1924_v35, %v1606_v0 }
 0x1fa   : > { %1609 = vst [vmem:[%s216_s13] sm:$0xff] %v1922_v2 }
 0x1fb   : > { %1610 = vst [vmem:[%s216_s13 + $0x8] sm:$0xff] %v1925_v13 }
 0x1fc   : > { %2045 = shalt.err (!%p2042_p7)
}
 0x1fd   : > { %s2046_s5 = scalar_lea.hbm %s2644_s23, 256  ;;  %s2050_s8 = scalar_lea.hbm %s2690_s4, 512 }
 0x1fe   : > { %p2047_p8 = scmp.ne.s32.totalorder %s2644_s23, %s2046_s5  ;;  %p2051_p1 = scmp.lt.u32.totalorder %s2644_s23, %s2690_s4 }
 0x1ff   : > { %p2052_p0 = scmp.lt.u32.totalorder %s2050_s8, %s2046_s5  ;;  %p2054_p6 = scmp.lt.u32.totalorder %s2046_s5, %s2644_s23 }
 0x200   : > { %p2048_p11 = pnand %p2047_p8, %p2791_p9 }
 0x201   : > { %p2053_p5 = por %p2052_p0, %p2051_p1 }
 0x202   : > { %p2049_p13 = pneg %p2048_p11 }
 0x203   : > { %p2055_p10 = por %p2054_p6, %p2053_p5 }
 0x205   : > { %p2056_p12 = pnand %p2055_p10, %p2049_p13 }
 0x207   : > { %2059 = shalt.err (!%p2056_p12)
}
 0x208   : > { %1946 = dma.vmem_to_hbm [thread:$0]  (%p2791_p9), %s2646_s14, 256, %s2644_s23, %s1612_s27  }
 0x209 PF: > { %p1958_p2 = scmp.ge.s32.totalorder %s2098_s18, 2  ;;  %s1638_s11 = sand.u32 1, %s2086_s15  }
 0x20a   : > { %p2792_p3 = scmp.ne.s32.totalorder %s2713_s26, 0  ;;  %s1639_s12 = scalar_lea.sflag [#allocation4], %s1638_s11 }
 0x20c   : > { %p1953_p4 = pnand %p1958_p2, %p2792_p3 }
 0x20e   : > { %2081 = dma.done.wait (!%p1953_p4), %s1639_s12, 256  }
 0x20f   : > { %2083 = vsyncadd (!%p1953_p4), %s1639_s12, 4294967040  ;;  %p15_p7 = scmp.ge.s32.totalorder %s2159_s21, 4   ;;  %s2793_s15 = smov %s2090_s16 }
 0x210   : > { %s2794_s16 = smov %s2094_s17  ;;  %s2795_s17 = smov %s2170_s24 }
 0x211   : > { %s2796_s18 = smov %s2159_s21  ;;  %17 = sbr.rel (!%p15_p7) target bundleno = 4 (0x4), region = 79 }
 0x218   :  { %1644 = vsyncpa [#allocation3], 1 }
 0x219   :  { %1646 = vsyncpa [#allocation3 + $0x1], 1 }
 0x21a   :  { %1647 = vsyncpa [#allocation4], 1 }
 0x21b   :  { %1649 = vsyncpa [#allocation4 + $0x1], 1 }

</bundles_post_ra>
